<compile_context>
chip_gen: v6e
topology: v6e:2x2x1
jax: 0.10.0
libtpu: 0.0.40
codegen_flags: <defaults>
</compile_context>

<pallas_src>
import functools

import jax
import jax.numpy as jnp
from jax import lax
from jax.experimental import pallas as pl
from jax.experimental.pallas import tpu as pltpu

EPS = 1e-5  # torch.nn.GroupNorm default eps


# ----------------------------------------------------------------------------
# Kernels
# ----------------------------------------------------------------------------
def _gnorm_single_kernel(x_ref, g_ref, b_ref, o_ref, *, fn, eps):
    """One whole (R, L) batch slab resident in VMEM; fused norm + affine + fn."""
    x = x_ref[0].astype(jnp.float32)          # (R, L)
    mean = jnp.mean(x)
    centered = x - mean
    var = jnp.mean(centered * centered)
    rstd = lax.rsqrt(var + eps)
    gamma = g_ref[...]                        # (R, 1) f32 (row-expanded)
    beta = b_ref[...]                         # (R, 1) f32
    scale = gamma * rstd                      # (R, 1)
    shift = beta - mean * scale               # (R, 1)
    y = fn(x * scale + shift)                 # 2 VALU ops/elem + fused fn (EUP)
    o_ref[0] = y.astype(o_ref.dtype)


def _gnorm_stats_kernel(x_ref, sum_ref, sq_ref):
    """Pass 1 of the tiled path: accumulate per-batch sum / sumsq over row tiles."""
    @pl.when(pl.program_id(1) == 0)
    def _():
        sum_ref[...] = jnp.zeros_like(sum_ref)
        sq_ref[...] = jnp.zeros_like(sq_ref)

    x = x_ref[0].astype(jnp.float32)          # (tile_r, L)
    tr, lanes = x.shape
    xg = x.reshape(tr // 8, 8, lanes)         # sublane-aligned groups -> VALU adds
    sum_ref[0] += jnp.sum(xg, axis=0)         # (8, L) partial accumulator
    sq_ref[0] += jnp.sum(xg * xg, axis=0)


def _gnorm_norm_kernel(stats_ref, x_ref, g_ref, b_ref, o_ref, *, fn):
    """Pass 2 of the tiled path: normalize + affine + fused fn, tile-by-tile."""
    b = pl.program_id(0)
    mean = stats_ref[b, 0]                    # f32 scalars from SMEM
    rstd = stats_ref[b, 1]
    x = x_ref[0].astype(jnp.float32)          # (tile_r, L)
    gamma = g_ref[...]                        # (tile_r, 1) f32
    beta = b_ref[...]                         # (tile_r, 1) f32
    scale = gamma * rstd
    shift = beta - mean * scale
    y = fn(x * scale + shift)
    o_ref[0] = y.astype(o_ref.dtype)


# ----------------------------------------------------------------------------
# Wrappers
# ----------------------------------------------------------------------------
def _vmem_capacity_bytes():
    try:
        cap = getattr(pltpu.get_tpu_info(), "vmem_capacity_bytes", None)
        if cap:
            return int(cap)
    except Exception:
        pass
    return 64 * 1024 * 1024  # conservative (v7x per-TensorCore)


def _pick_tile_rows(r, max_rows):
    """Largest divisor of r that is a multiple of 8 and <= max_rows (else None)."""
    for t in range(min(r, max_rows), 7, -1):
        if r % t == 0 and t % 8 == 0:
            return t
    return None


def _single_slab_call(x3, g_rows, b_rows, fn, eps, vmem_limit):
    n, r, lanes = x3.shape
    kern = functools.partial(_gnorm_single_kernel, fn=fn, eps=eps)
    return pl.pallas_call(
        kern,
        out_shape=jax.ShapeDtypeStruct((n, r, lanes), x3.dtype),
        grid_spec=pltpu.PrefetchScalarGridSpec(
            num_scalar_prefetch=0,
            grid=(n,),
            in_specs=[
                pl.BlockSpec((1, r, lanes), lambda i: (i, 0, 0)),
                pl.BlockSpec((r, 1), lambda i: (0, 0)),
                pl.BlockSpec((r, 1), lambda i: (0, 0)),
            ],
            out_specs=pl.BlockSpec((1, r, lanes), lambda i: (i, 0, 0)),
        ),
        compiler_params=pltpu.CompilerParams(
            dimension_semantics=("parallel",),
            vmem_limit_bytes=int(vmem_limit),
        ),
    )(x3, g_rows, b_rows)


def _tiled_call(x3, g_rows, b_rows, fn, eps, tile_r):
    n, r, lanes = x3.shape
    num_tiles = r // tile_r

    # ---- Pass 1: per-batch partial sums, accumulated over the row-tile axis.
    sums, sqs = pl.pallas_call(
        _gnorm_stats_kernel,
        out_shape=(jax.ShapeDtypeStruct((n, 8, lanes), jnp.float32),
                   jax.ShapeDtypeStruct((n, 8, lanes), jnp.float32)),
        grid_spec=pltpu.PrefetchScalarGridSpec(
            num_scalar_prefetch=0,
            grid=(n, num_tiles),
            in_specs=[pl.BlockSpec((1, tile_r, lanes), lambda b, k: (b, k, 0))],
            out_specs=[pl.BlockSpec((1, 8, lanes), lambda b, k: (b, 0, 0)),
                       pl.BlockSpec((1, 8, lanes), lambda b, k: (b, 0, 0))],
        ),
        compiler_params=pltpu.CompilerParams(
            dimension_semantics=("parallel", "arbitrary")),
    )(x3)

    cnt = jnp.float32(r * lanes)
    total = sums.sum(axis=(1, 2))
    total_sq = sqs.sum(axis=(1, 2))
    mean = total / cnt
    var = jnp.maximum(total_sq / cnt - mean * mean, 0.0)
    rstd = lax.rsqrt(var + eps)
    stats = jnp.stack([mean, rstd], axis=-1).astype(jnp.float32)  # (n, 2)

    # ---- Pass 2: normalize + affine + fused fn, tile-by-tile (fully parallel).
    kern = functools.partial(_gnorm_norm_kernel, fn=fn)
    return pl.pallas_call(
        kern,
        out_shape=jax.ShapeDtypeStruct((n, r, lanes), x3.dtype),
        grid_spec=pltpu.PrefetchScalarGridSpec(
            num_scalar_prefetch=0,
            grid=(n, num_tiles),
            in_specs=[
                pl.BlockSpec(memory_space=pltpu.MemorySpace.SMEM),   # (n, 2) stats
                pl.BlockSpec((1, tile_r, lanes), lambda b, k: (b, k, 0)),
                pl.BlockSpec((tile_r, 1), lambda b, k: (k, 0)),
                pl.BlockSpec((tile_r, 1), lambda b, k: (k, 0)),
            ],
            out_specs=pl.BlockSpec((1, tile_r, lanes), lambda b, k: (b, k, 0)),
        ),
        compiler_params=pltpu.CompilerParams(
            dimension_semantics=("parallel", "parallel")),
    )(stats, x3, g_rows, b_rows)


def group_norm_pallas(x, gamma, beta, fn=None, *, eps=EPS,
                      force_tiled=False, max_tile_rows=2048):
    """fn(GroupNorm(num_groups=1, num_channels=C)(x)) for an NCHW tensor.

    `fn` must be an elementwise JAX-traceable function (it is fused into the
    kernel epilogue); pass None for identity.
    """
    if fn is None:
        fn = lambda v: v
    n, c, h, w = x.shape
    hw = h * w

    # Sublane-dense layout: (C, HW) -> (R, 128) when possible so small C does
    # not waste vreg sublanes / VMEM.  Otherwise fall back to (C, HW) layout
    # (still correct; stores may be masked if HW is not a multiple of 128).
    lanes = 128 if hw % 128 == 0 else hw
    rows_per_ch = hw // lanes
    r = c * rows_per_ch
    x3 = x.reshape(n, r, lanes)
    g_rows = jnp.repeat(gamma.astype(jnp.float32), rows_per_ch).reshape(r, 1)
    b_rows = jnp.repeat(beta.astype(jnp.float32), rows_per_ch).reshape(r, 1)

    # Per-generation VMEM budgeting (v7x has half the VMEM of v5e/v6e).
    cap = _vmem_capacity_bytes()
    budget = cap // 2
    isz = x.dtype.itemsize
    # 2x double-buffered input + 2x output + ~4 f32 full-slab temporaries.
    need = r * lanes * (4 * isz + 16)

    tile_r = None
    if force_tiled or need > budget:
        tile_r = _pick_tile_rows(r, max_tile_rows)
        # TODO(synk): if R has no multiple-of-8 divisor (ragged), pad rows
        # instead of falling back to the single-slab path.

    if tile_r is None:
        out = _single_slab_call(x3, g_rows, b_rows, fn, eps, budget)
    else:
        out = _tiled_call(x3, g_rows, b_rows, fn, eps, tile_r)
    return out.reshape(n, c, h, w)


def gnorm(x, gamma, beta, fn, **kwargs):
    """Equivalent of GNorm.forward: fn(GroupNorm(1, dim)(x)), fn fused in-kernel."""
    # TODO(synk): `fn` is an arbitrary wrapped nn.Module in the PyTorch code;
    # only elementwise JAX-traceable fns can be fused into the kernel epilogue.
    return group_norm_pallas(x, gamma, beta, fn, **kwargs)


# ----------------------------------------------------------------------------
# Demo / correctness check
# ----------------------------------------------------------------------------
if __name__ == "__main__":
    key = jax.random.PRNGKey(0)
    fn = jax.nn.silu  # stand-in for the wrapped module

    def reference(x, gamma, beta):
        xf = x.astype(jnp.float32)
        mean = xf.mean(axis=(1, 2, 3), keepdims=True)
        var = ((xf - mean) ** 2).mean(axis=(1, 2, 3), keepdims=True)
        y = (xf - mean) * lax.rsqrt(var + EPS)
        y = y * gamma[None, :, None, None] + beta[None, :, None, None]
        return fn(y).astype(x.dtype)

    # ---- small shape: single-slab fused path -------------------------------
    N, C, H, W = 2, 4, 16, 16
    k1, k2 = jax.random.split(key)
    x = jax.random.normal(k1, (N, C, H, W), dtype=jnp.float32)
    gamma = jnp.ones((C,), jnp.float32) + 0.1 * jnp.arange(C, dtype=jnp.float32)
    beta = 0.05 * jnp.arange(C, dtype=jnp.float32)

    y = gnorm(x, gamma, beta, fn)
    jax.block_until_ready(y)
    assert jnp.allclose(y, reference(x, gamma, beta), atol=1e-5, rtol=1e-5), \
        "single-slab path mismatch vs reference"

    # ---- larger shape: force the tiled two-pass (VMEM-bounded) path --------
    N2, C2, H2, W2 = 2, 4, 32, 32
    x2 = jax.random.normal(k2, (N2, C2, H2, W2), dtype=jnp.float32)
    y2 = gnorm(x2, gamma, beta, fn, force_tiled=True, max_tile_rows=8)
    jax.block_until_ready(y2)
    assert jnp.allclose(y2, reference(x2, gamma, beta), atol=1e-4, rtol=1e-4), \
        "tiled two-pass path mismatch vs reference"

    print("KERNEL_OK")
</pallas_src>

<mosaic_0001>
module attributes {stable_mosaic.version = 11 : i64} {
  func.func @_gnorm_single_kernel(%arg0: i32, %arg1: memref<1x8x128xf32, #tpu.memory_space<vmem>>, %arg2: memref<8x1xf32, #tpu.memory_space<vmem>>, %arg3: memref<8x1xf32, #tpu.memory_space<vmem>>, %arg4: memref<1x8x128xf32, #tpu.memory_space<vmem>>) attributes {dimension_semantics = [#tpu.dimension_semantics<parallel>], iteration_bounds = array<i64: 2>, scalar_prefetch = 0 : i64, scratch_operands = 0 : i64, tpu.core_type = #tpu.core_type<tc>, window_params = [{transform_indices = @transform_0, window_bounds = array<i64: 1, 8, 128>}, {pipeline_mode = #tpu.pipeline_mode<synchronous>, transform_indices = @transform_1, window_bounds = array<i64: 8, 1>}, {pipeline_mode = #tpu.pipeline_mode<synchronous>, transform_indices = @transform_2, window_bounds = array<i64: 8, 1>}, {transform_indices = @transform_3, window_bounds = array<i64: 1, 8, 128>}]} {
    %c0 = arith.constant 0 : index
    %c0_0 = arith.constant 0 : index
    %c0_1 = arith.constant 0 : index
    %0 = vector.load %arg1[%c0, %c0_0, %c0_1] : memref<1x8x128xf32, #tpu.memory_space<vmem>>, vector<1x8x128xf32>
    %1 = vector.shape_cast %0 : vector<1x8x128xf32> to vector<8x128xf32>
    %2 = vector.shape_cast %1 : vector<8x128xf32> to vector<1x8x128xf32>
    %cst = arith.constant dense<0.000000e+00> : vector<1xf32>
    %3 = vector.multi_reduction <add>, %2, %cst [1, 2] : vector<1x8x128xf32> to vector<1xf32>
    %4 = vector.shape_cast %3 : vector<1xf32> to vector<1x1x1xf32>
    %5 = vector.extract %4[0, 0, 0] : f32 from vector<1x1x1xf32>
    %cst_2 = arith.constant 1.024000e+03 : f32
    %6 = arith.divf %5, %cst_2 : f32
    %7 = vector.broadcast %6 : f32 to vector<8x128xf32>
    %8 = arith.subf %1, %7 : vector<8x128xf32>
    %9 = arith.mulf %8, %8 : vector<8x128xf32>
    %10 = vector.shape_cast %9 : vector<8x128xf32> to vector<1x8x128xf32>
    %cst_3 = arith.constant dense<0.000000e+00> : vector<1xf32>
    %11 = vector.multi_reduction <add>, %10, %cst_3 [1, 2] : vector<1x8x128xf32> to vector<1xf32>
    %12 = vector.shape_cast %11 : vector<1xf32> to vector<1x1x1xf32>
    %13 = vector.extract %12[0, 0, 0] : f32 from vector<1x1x1xf32>
    %cst_4 = arith.constant 1.024000e+03 : f32
    %14 = arith.divf %13, %cst_4 : f32
    %cst_5 = arith.constant 9.99999974E-6 : f32
    %15 = arith.addf %14, %cst_5 : f32
    %16 = math.rsqrt %15 : f32
    %c0_6 = arith.constant 0 : index
    %c0_7 = arith.constant 0 : index
    %17 = vector.load %arg2[%c0_6, %c0_7] : memref<8x1xf32, #tpu.memory_space<vmem>>, vector<8x1xf32>
    %c0_8 = arith.constant 0 : index
    %c0_9 = arith.constant 0 : index
    %18 = vector.load %arg3[%c0_8, %c0_9] : memref<8x1xf32, #tpu.memory_space<vmem>>, vector<8x1xf32>
    %19 = vector.broadcast %16 : f32 to vector<8x1xf32>
    %20 = arith.mulf %17, %19 : vector<8x1xf32>
    %21 = vector.broadcast %6 : f32 to vector<8x1xf32>
    %22 = arith.mulf %21, %20 : vector<8x1xf32>
    %23 = arith.subf %18, %22 : vector<8x1xf32>
    %24 = vector.broadcast %20 : vector<8x1xf32> to vector<8x128xf32>
    %25 = arith.mulf %1, %24 : vector<8x128xf32>
    %26 = vector.broadcast %23 : vector<8x1xf32> to vector<8x128xf32>
    %27 = arith.addf %25, %26 : vector<8x128xf32>
    %28 = arith.negf %27 : vector<8x128xf32>
    %29 = math.exp %28 : vector<8x128xf32>
    %cst_10 = arith.constant 1.000000e+00 : f32
    %30 = vector.broadcast %cst_10 : f32 to vector<8x128xf32>
    %31 = arith.addf %30, %29 : vector<8x128xf32>
    %32 = arith.divf %30, %31 : vector<8x128xf32>
    %33 = arith.mulf %27, %32 : vector<8x128xf32>
    %c0_11 = arith.constant 0 : index
    %c0_12 = arith.constant 0 : index
    %c0_13 = arith.constant 0 : index
    %34 = vector.load %arg4[%c0_11, %c0_12, %c0_13] : memref<1x8x128xf32, #tpu.memory_space<vmem>>, vector<1x8x128xf32>
    %35 = vector.shape_cast %34 : vector<1x8x128xf32> to vector<8x128xf32>
    %36 = vector.shape_cast %33 : vector<8x128xf32> to vector<1x8x128xf32>
    tpu.vector_store %arg4[%c0_11, %c0_12, %c0_13], %36 {strides = array<i32>} : memref<1x8x128xf32, #tpu.memory_space<vmem>>, vector<1x8x128xf32>,
    return
  }
  func.func @transform_0(%arg0: i32) -> (i32, i32, i32) {
    %c0_i32 = arith.constant 0 : i32
    %c0_i32_0 = arith.constant 0 : i32
    %c0_i32_1 = arith.constant 0 : i32
    return %arg0, %c0_i32, %c0_i32_0 : i32, i32, i32
  }
  func.func @transform_1(%arg0: i32) -> (i32, i32) {
    %c0_i32 = arith.constant 0 : i32
    %c0_i32_0 = arith.constant 0 : i32
    %c0_i32_1 = arith.constant 0 : i32
    return %c0_i32, %c0_i32_0 : i32, i32
  }
  func.func @transform_2(%arg0: i32) -> (i32, i32) {
    %c0_i32 = arith.constant 0 : i32
    %c0_i32_0 = arith.constant 0 : i32
    %c0_i32_1 = arith.constant 0 : i32
    return %c0_i32, %c0_i32_0 : i32, i32
  }
  func.func @transform_3(%arg0: i32) -> (i32, i32, i32) {
    %c0_i32 = arith.constant 0 : i32
    %c0_i32_0 = arith.constant 0 : i32
    %c0_i32_1 = arith.constant 0 : i32
    return %arg0, %c0_i32, %c0_i32_0 : i32, i32, i32
  }
}

</mosaic_0001>

<bundles_post_ra>
// kernel: tpu_custom_call.1
= control target key start
LH: loop header
LB: loop body
LE: loop exit
PB: predicated region body
PF: predicated region fallthrough
CT: control target
= control target key end

     0   :  { %8 = vsyncpa [#allocation3], 0  ;;  %s539_s0 = inlined_call_operand.vmem [shape: f32[2,8,128], index: 0, kind: input, shape index: {}]   ;;  %s540_s1 = inlined_call_operand.vmem [shape: f32[8,1], index: 1, kind: input, shape index: {}]   ;;  %s541_s2 = inlined_call_operand.vmem [shape: f32[8,1], index: 2, kind: input, shape index: {}]   ;;  %s542_s3 = inlined_call_operand.hbm [shape: f32[2,8,128], index: 3, kind: output, shape index: {}]  }
   0x1   :  { %10 = vsyncpa [#allocation3 + $0x1], 0  ;;  %s446_s12 = smov 0   ;;  %s448_s13 = smov 0  }
   0x2   :  { %s450_s14 = smov 0   ;;  %s452_s15 = smov 0  }
   0x3 LB: > { %s467_s16 = sadd.s32 4294967295, %s422_s15   ;;  %s297_s17 = sadd.s32 4294967294, %s422_s15   ;;  %s422_s15 = sphi %s452_s15, %s548_s15   ;;  %s418_s14 = sphi %s450_s14, %s547_s14   ;;  %s414_s13 = sphi %s448_s13, %s546_s13   ;;  %s410_s12 = sphi %s446_s12, %s545_s12  }
   0x4   : > { %s471_s18 = sadd.s32 1, %s422_s15   ;;  %s91_s19 = sadd.s32 1, %s418_s14 }
   0x5   : > { %s88_s20 = ssub.s32 %s422_s15, %s471_s18  ;;  %p101_p0 = scmp.ne.s32.totalorder %s418_s14, %s414_s13 }
   0x6   : > { %p89_p1 = scmp.eq.s32.totalorder %s88_s20, 0  ;;  %p102_p2 = scmp.eq.s32.totalorder %s467_s16, 1 }
   0x7   : > { %p107_p3 = scmp.ne.s32.totalorder %s414_s13, %s410_s12  ;;  %p108_p4 = scmp.eq.s32.totalorder %s297_s17, 1 }
   0x8   : > { %s482_s21 = scalar_select %p89_p1, %s418_s14, %s91_s19  }
   0x9   : > { %p484_p5 = por %p102_p2, %p101_p0  ;;  %p488_p6 = por %p108_p4, %p107_p3 }
   0xa   : > { %p300_p7 = scmp.ge.s32.totalorder %s422_s15, 1  ;;  %p139_p8 = scmp.lt.s32.totalorder %s422_s15, 3 }
   0xc   : > { %p140_p9 = pnand %p300_p7, %p139_p8 }
   0xd   : > { %p162_p10 = scmp.lt.s32.totalorder (!%p140_p9), %s467_s16, 1  ;;  %s159_s17 = sand.u32 (!%p140_p9), 1, %s414_s13  }
   0xe   : > { %143 = sbr.rel (%p140_p9) target bundleno = 680 (0x2a8), region = 32  ;;  %s301_s19 = sshll.u32 (!%p140_p9), %s159_s17, 3 }
   0xf   : > { %s305_s20 = sshll.u32 (!%p140_p9), %s467_s16, 7 }
  0x13   : > { %s163_s24 = scalar_select %p162_p10, %s467_s16, 1  ;;  %v424_v15 = vmov 0   ;;  %v198_v21 = vld [vmem:[%s540_s1] sm:$0xff] }
  0x14   : > { %354 = vset.pattern.permute.xlu1 %v424_v15  ;;  %355 = vset.pattern.permute.xlu0 %v424_v15  ;;  %v199_v24 = vld [vmem:[%s541_s2] sm:$0xff] }
  0x15   : > { %s302_s25 = sshll.u32 %s163_s24, 3  ;;  %s161_s24 = scalar_lea.vmem [#allocation2], %s301_s19 }
  0x16   : > { %s165_s28 = scalar_lea.vmem %s539_s0, %s302_s25  ;;  %s238_s25 = sshll.u32 %s161_s24, 4  ;;  %s239_s25 = int_to_ptr.vmem [resolvable:$true] %s238_s25 }
  0x17   : > { %v166_v0 = vld [vmem:[%s165_s28] sm:$0xff]  ;;  %s236_s28 = scalar_lea.hbm %s542_s3, %s305_s20 }
  0x18   : > { %167 = vadd.xlane.f32.xlu0 %v166_v0 }
  0xa1   : > { %v168_v1 = vpop.xlane.xlu0 %167 }
  0xa2   : > { %v169_v2 = vrot.slane %v168_v1, 4 }
  0xa4   : > { %v170_v3 = vadd.f32 %v169_v2, %v168_v1 }
  0xa6   : > { %v171_v4 = vrot.slane %v170_v3, 2 }
  0xa8   : > { %v172_v5 = vadd.f32 %v171_v4, %v170_v3 }
  0xaa   : > { %v173_v6 = vrot.slane %v172_v5, 1 }
  0xac   : > { %v174_v7 = vadd.f32 %v173_v6, %v172_v5 }
  0xae   : > { %308 = vpush %v174_v7 }
  0xdf   : > { %s309_s29 = spop %308 }
  0xe0   : > { %s178_s30 = smul.f32 0.0009765625, %s309_s29  ;;  %s225_s29 = scalar_lea.sflag [#allocation3], %s159_s17 }
  0xe2   : > { %v179_v8 = vstv %s178_s30  ;;  %s362_s30 = scalar_lea.vmem %s239_s25, 128 }
  0xe3   : > { %v180_v9 = vsub.f32 %v166_v0, %v179_v8  ;;  %p363_p11 = scmp.ne.s32.totalorder %s239_s25, %s362_s30 }
  0xe5   : > { %v181_v10 = vmul.f32 %v180_v9, %v180_v9  ;;  %p364_p12 = pnand %p363_p11, %p484_p5 }
  0xe7   : > { %182 = vadd.xlane.f32.xlu0 %v181_v10  ;;  %p365_p13 = pneg %p364_p12 }
 0x170   : > { %v183_v11 = vpop.xlane.xlu0 %182 }
 0x171   : > { %v184_v12 = vrot.slane %v183_v11, 4 }
 0x173   : > { %v185_v13 = vadd.f32 %v184_v12, %v183_v11 }
 0x175   : > { %v186_v14 = vrot.slane %v185_v13, 2 }
 0x177   : > { %v187_v16 = vadd.f32 %v186_v14, %v185_v13 }
 0x179   : > { %v188_v17 = vrot.slane %v187_v16, 1 }
 0x17b   : > { %v189_v18 = vadd.f32 %v188_v17, %v187_v16 }
 0x17d   : > { %310 = vpush %v189_v18 }
 0x1ae   : > { %s311_s4 = spop %310 }
 0x1af   : > { %s193_s5 = smul.f32 0.0009765625, %s311_s4  ;;  %s425_s4 = smov [#allocation2]  }
 0x1b1   : > { %s194_s6 = sadd.f32 1e-05, %s193_s5  ;;  %s366_s5 = sshll.u32 %s425_s4, 4  ;;  %s367_s5 = int_to_ptr.vmem [resolvable:$false] %s366_s5 }
 0x1b2   : > { %s368_s16 = scalar_lea.vmem %s367_s5, 256  ;;  %p369_p0 = scmp.lt.s32.totalorder %s239_s25, %s367_s5 }
 0x1b3   : > { %v195_v19 = vstv %s194_s6  ;;  %p370_p1 = scmp.lt.s32.totalorder %s368_s16, %s362_s30 }
 0x1b4   : > { %356 = vrsqrt.f32 %v195_v19 }
 0x1b5   : > { %p371_p2 = por %p370_p1, %p369_p0 }
 0x1b7   : > { %p372_p3 = pnand %p371_p2, %p365_p13 }
 0x1c1   : > { %v357_v20 = vpop.eup %356 }
 0x1c2   : > { %312 = vpush %v357_v20 }
 0x1f3   : > { %s313_s9 = spop %312 }
 0x1f4   : > { %v200_v22 = vstv %s313_s9 }
 0x1f5   : > { %v201_v23 = vmul.f32 %v200_v22, %v198_v21 }
 0x1f7   : > { %v202_v25 = vmul.f32 %v201_v23, %v179_v8  ;;  %206 = vperm.xlu1 %354, %v201_v23  }
 0x1f9   : > { %v203_v26 = vsub.f32 %v199_v24, %v202_v25 }
 0x1fb   : > { %212 = vperm.xlu1 %354, %v203_v26  }
 0x272   : > { %v207_v27 = vpop.permute.xlu1 %206 }
 0x273   : > { %v209_v28 = vmul.f32 %v207_v27, %v166_v0 }
 0x276   : > { %v213_v29 = vpop.permute.xlu1 %212 }
 0x277   : > { %v215_v30 = vadd.f32 %v213_v29, %v209_v28 }
 0x279   : > { %v303_v31 = vmul.f32 -1.442695, %v215_v30 }
 0x27b   : > { %358 = vpow2.f32 %v303_v31 }
 0x288   : > { %v359_v32 = vpop.eup %358 }
 0x289   : > { %v219_v33 = vadd.f32 1.0, %v359_v32 }
 0x28b   : > { %360 = vrcp.f32 %v219_v33 }
 0x298   : > { %v361_v34 = vpop.eup %360 }
 0x299   : > { %v222_v35 = vmul.f32 %v361_v34, %v215_v30 }
 0x29b   : > { %223 = vst [vmem:[%s161_s24] sm:$0xff] %v222_v35 }
 0x29c   : > { %375 = shalt.err (!%p372_p3)
}
 0x29d   : > { %s376_s6 = scalar_lea.hbm %s236_s28, 128  ;;  %s380_s9 = scalar_lea.hbm %s542_s3, 256 }
 0x29e   : > { %p377_p4 = scmp.ne.s32.totalorder %s236_s28, %s376_s6  ;;  %p381_p9 = scmp.lt.s32.totalorder %s236_s28, %s542_s3 }
 0x29f   : > { %p382_p10 = scmp.lt.s32.totalorder %s380_s9, %s376_s6 }
 0x2a0   : > { %p378_p7 = pnand %p377_p4, %p484_p5 }
 0x2a1   : > { %p383_p11 = por %p382_p10, %p381_p9 }
 0x2a2   : > { %p379_p8 = pneg %p378_p7 }
 0x2a4   : > { %p384_p12 = pnand %p383_p11, %p379_p8 }
 0x2a6   : > { %387 = shalt.err (!%p384_p12)
}
 0x2a7   : > { %314 = dma.vmem_to_hbm [thread:$0]  (%p484_p5), %s239_s25, 128, %s236_s28, %s225_s29  }
 0x2a8 PF: > { %p320_p13 = scmp.ge.s32.totalorder %s422_s15, 2  ;;  %s250_s17 = sand.u32 1, %s410_s12  }
 0x2a9   : > { %s251_s19 = scalar_lea.sflag [#allocation3], %s250_s17 }
 0x2aa   : > { %p317_p0 = pnand %p320_p13, %p488_p6 }
 0x2ac   : > { %p318_p1 = pneg %p317_p0 }
 0x2ae   : > { %405 = dma.done.wait (%p318_p1), %s251_s19, 128  }
 0x2af   : > { %407 = vsyncadd (%p318_p1), %s251_s19, 4294967168  ;;  %p13_p2 = scmp.ge.s32.totalorder %s471_s18, 4   ;;  %s545_s12 = smov %s414_s13 }
 0x2b0   : > { %s546_s13 = smov %s418_s14  ;;  %s547_s14 = smov %s482_s21 }
 0x2b1   : > { %s548_s15 = smov %s471_s18  ;;  %15 = sbr.rel (!%p13_p2) target bundleno = 3 (0x3), region = 67 }
 0x2b6   :  { %256 = vsyncpa [#allocation3], 1 }
 0x2b7   :  { %258 = vsyncpa [#allocation3 + $0x1], 1 }

</bundles_post_ra>
